<compile_context>
chip_gen: v6e
topology: v6e:2x2x1
jax: 0.10.0
libtpu: 0.0.40
codegen_flags: <defaults>
</compile_context>

<pallas_src>
import functools

import jax
import jax.numpy as jnp
from jax.experimental import pallas as pl
from jax.experimental.pallas import tpu as pltpu

LV_OFF = 128  # logvar output columns start at a lane-tile boundary


def club_sample_kernel(x_ref, y_ref, yp_ref, w_ref, b_ref, out_ref, acc_ref,
                       *, x_dim, h2, y_dim, inv_2n):
    j = pl.program_id(1)
    two_h2 = 2 * h2
    z_cols = LV_OFF + y_dim

    @pl.when(j == 0)
    def _init():
        acc_ref[...] = jnp.zeros_like(acc_ref)

    # Streamed inputs arrive as bf16; upcast immediately (v5e VPU/EUP lacks bf16).
    x = x_ref[...].astype(jnp.float32)
    y = y_ref[...].astype(jnp.float32)
    yp = yp_ref[...].astype(jnp.float32)

    # Fused layer 1: [W1m | W1v] -> one MXU matmul for both branches.
    w1 = w_ref[0, :x_dim, :two_h2]
    b1 = b_ref[0, :, :two_h2]
    h = jnp.maximum(jnp.dot(x, w1, preferred_element_type=jnp.float32) + b1, 0.0)

    # Fused layer 2: block-diagonal [[W2m, 0], [0, W2v]] with the logvar block
    # shifted to lane LV_OFF so both output slices start on a lane-tile boundary.
    w2 = w_ref[1, :two_h2, :z_cols]
    b2 = b_ref[1, :, :z_cols]
    z = jnp.dot(h, w2, preferred_element_type=jnp.float32) + b2

    mu = z[:, :y_dim]
    logvar = jnp.tanh(z[:, LV_OFF:LV_OFF + y_dim])
    inv_var = jnp.exp(-logvar)            # 1 / exp(logvar)

    # positive - negative = [(mu-yp)^2 - (mu-y)^2] * inv_var
    #                     = (y - yp) * (2*mu - y - yp) * inv_var
    term = (y - yp) * (2.0 * mu - y - yp) * inv_var          # (tn, y_dim) f32

    # Pure VPU vector accumulate each step; no per-step cross-lane reduce and no
    # scalar/SMEM round-trip in the steady state.
    acc_ref[...] += term

    @pl.when(j == pl.num_programs(1) - 1)
    def _finalize():
        s = jnp.sum(acc_ref[...]) * inv_2n
        # Broadcast the per-slice partial into the (1, 8, 128) output block; the
        # wrapper reads [:, 0, 0] and sums the slices.
        out_ref[...] = jnp.broadcast_to(s, out_ref.shape)


def pack_params(w1m, b1m, w2m, b2m, w1v, b1v, w2v, b2v):
    """Pack the 8 parameter tensors into one weight slab and one bias slab.

    Layer-1 weights are concatenated along the output dim; layer-2 weights are
    block-diagonal with the logvar block starting at column LV_OFF (=128) so the
    mu/logvar split in the kernel is lane-tile aligned.
    """
    x_dim, h2 = w1m.shape
    h2b, y_dim = w2m.shape
    assert h2b == h2
    assert y_dim <= LV_OFF, "lane-aligned packing assumes y_dim <= 128"
    two_h2 = 2 * h2
    z_cols = LV_OFF + y_dim

    rows = max(x_dim, two_h2)
    cols = max(two_h2, z_cols)

    w_slab = jnp.zeros((2, rows, cols), jnp.float32)
    w_slab = w_slab.at[0, :x_dim, :h2].set(w1m)
    w_slab = w_slab.at[0, :x_dim, h2:two_h2].set(w1v)
    w_slab = w_slab.at[1, :h2, :y_dim].set(w2m)
    w_slab = w_slab.at[1, h2:two_h2, LV_OFF:LV_OFF + y_dim].set(w2v)

    b_slab = jnp.zeros((2, 1, cols), jnp.float32)
    b_slab = b_slab.at[0, :, :h2].set(b1m)
    b_slab = b_slab.at[0, :, h2:two_h2].set(b1v)
    b_slab = b_slab.at[1, :, :y_dim].set(b2m)
    b_slab = b_slab.at[1, :, LV_OFF:LV_OFF + y_dim].set(b2v)
    return w_slab, b_slab


def club_sample_forward(x, y, y_perm, w_slab, b_slab, *, x_dim, h2, y_dim,
                        block_n=1024, num_slices=2,
                        stream_dtype=jnp.bfloat16, vmem_limit_bytes=None):
    n = x.shape[0]
    tn = min(block_n, n)
    assert n % tn == 0, "batch size must be divisible by block_n"
    assert tn == n or tn % 8 == 0, "block_n must be a multiple of 8 (sublane)"
    grid_n = n // tn

    # Split the batch loop across `num_slices` parallel slices (both v7x TCs);
    # fall back to 1 slice when the step count doesn't divide evenly.
    n_slices = num_slices if (num_slices > 1 and grid_n >= num_slices
                              and grid_n % num_slices == 0) else 1
    steps = grid_n // n_slices

    # Stream the batch in bf16 to halve HBM bytes (kernel is HBM-bound).
    xs = x.astype(stream_dtype)
    ys = y.astype(stream_dtype)
    yps = y_perm.astype(stream_dtype)

    if vmem_limit_bytes is None:
        esz = jnp.dtype(stream_dtype).itemsize
        # Streamed blocks (double-buffered) + lane-padded f32 intermediates
        # (h, z, mu/logvar/inv_var/term, f32 upcasts) per row, with margin.
        per_row = (2 * esz * (x.shape[1] + 2 * y.shape[1])
                   + 4 * (2 * h2 + 2 * LV_OFF + 8 * LV_OFF))
        need = tn * per_row + 32 * (w_slab.size + b_slab.size) + (4 << 20)
        vmem_limit_bytes = int(min(64 << 20, 2 * need))

    kernel = functools.partial(club_sample_kernel, x_dim=x_dim, h2=h2,
                               y_dim=y_dim, inv_2n=1.0 / (2.0 * n))

    out = pl.pallas_call(
        kernel,
        out_shape=jax.ShapeDtypeStruct((n_slices, 8, 128), jnp.float32),
        grid_spec=pltpu.PrefetchScalarGridSpec(
            num_scalar_prefetch=0,
            grid=(n_slices, steps),
            in_specs=[
                pl.BlockSpec((tn, x.shape[1]), lambda c, j: (c * steps + j, 0)),
                pl.BlockSpec((tn, y.shape[1]), lambda c, j: (c * steps + j, 0)),
                pl.BlockSpec((tn, y.shape[1]), lambda c, j: (c * steps + j, 0)),
                pl.BlockSpec(w_slab.shape, lambda c, j: (0, 0, 0)),  # resident
                pl.BlockSpec(b_slab.shape, lambda c, j: (0, 0, 0)),  # resident
            ],
            out_specs=pl.BlockSpec((1, 8, 128), lambda c, j: (c, 0, 0)),
            scratch_shapes=[pltpu.VMEM((tn, y.shape[1]), jnp.float32)],
        ),
        compiler_params=pltpu.CompilerParams(
            dimension_semantics=("parallel", "arbitrary"),
            vmem_limit_bytes=vmem_limit_bytes),
    )(xs, ys, yps, w_slab, b_slab)

    return jnp.sum(out[:, 0, 0])


def init_linear(key, fan_in, fan_out):
    # PyTorch nn.Linear default init: U(-1/sqrt(fan_in), 1/sqrt(fan_in))
    kw, kb = jax.random.split(key)
    bound = 1.0 / jnp.sqrt(fan_in)
    w = jax.random.uniform(kw, (fan_in, fan_out), jnp.float32, -bound, bound)
    b = jax.random.uniform(kb, (1, fan_out), jnp.float32, -bound, bound)
    return w, b


def reference_forward(x, y, y_perm, params):
    (w1m, b1m, w2m, b2m, w1v, b1v, w2v, b2v) = params
    mu = jnp.maximum(x @ w1m + b1m, 0.0) @ w2m + b2m
    logvar = jnp.tanh(jnp.maximum(x @ w1v + b1v, 0.0) @ w2v + b2v)
    pos = -(mu - y) ** 2 / jnp.exp(logvar)
    neg = -(mu - y_perm) ** 2 / jnp.exp(logvar)
    return jnp.mean(pos.sum(-1) - neg.sum(-1)) / 2.0


if __name__ == "__main__":
    # Shapes consistent with CLUBSample(x_dim=32, y_dim=16, hidden_size=32)
    X_DIM, Y_DIM, HIDDEN = 32, 16, 32
    H2 = HIDDEN // 2

    key = jax.random.PRNGKey(0)
    k1, k2, k3, k4, k_small, k_big = jax.random.split(key, 6)

    w1m, b1m = init_linear(k1, X_DIM, H2)
    w2m, b2m = init_linear(k2, H2, Y_DIM)
    w1v, b1v = init_linear(k3, X_DIM, H2)
    w2v, b2v = init_linear(k4, H2, Y_DIM)
    params = (w1m, b1m, w2m, b2m, w1v, b1v, w2v, b2v)
    w_slab, b_slab = pack_params(*params)

    def run_case(case_key, n, block_n, num_slices):
        kx, ky, kp = jax.random.split(case_key, 3)
        x = jax.random.normal(kx, (n, X_DIM), jnp.float32)
        y = jax.random.normal(ky, (n, Y_DIM), jnp.float32)
        perm = jax.random.permutation(kp, n)   # torch.randperm equivalent (glue)
        y_perm = y[perm]

        out = club_sample_forward(x, y, y_perm, w_slab, b_slab,
                                  x_dim=X_DIM, h2=H2, y_dim=Y_DIM,
                                  block_n=block_n, num_slices=num_slices)
        jax.block_until_ready(out)

        # Reference on the same bf16-rounded inputs the kernel streams
        # (bf16 streaming is a perf choice; math inside the kernel is f32).
        xb = x.astype(jnp.bfloat16).astype(jnp.float32)
        yb = y.astype(jnp.bfloat16).astype(jnp.float32)
        ypb = y_perm.astype(jnp.bfloat16).astype(jnp.float32)
        ref = reference_forward(xb, yb, ypb, params)
        assert jnp.allclose(out, ref, rtol=1e-3, atol=1e-3), (n, out, ref)

    # Small case (single block, single slice).
    run_case(k_small, n=8, block_n=1024, num_slices=2)
    # Larger case exercising the streamed grid and the 2-slice (megacore) path:
    # grid = (2 slices, 4 steps) of 256-row tiles.
    run_case(k_big, n=2048, block_n=256, num_slices=2)

    print("KERNEL_OK")
</pallas_src>

<mosaic_0001>
module attributes {stable_mosaic.version = 11 : i64} {
  func.func @club_sample_kernel(%arg0: i32, %arg1: i32, %arg2: memref<8x32xbf16, #tpu.memory_space<vmem>>, %arg3: memref<8x16xbf16, #tpu.memory_space<vmem>>, %arg4: memref<8x16xbf16, #tpu.memory_space<vmem>>, %arg5: memref<2x32x144xf32, #tpu.memory_space<vmem>>, %arg6: memref<2x1x144xf32, #tpu.memory_space<vmem>>, %arg7: memref<1x8x128xf32, #tpu.memory_space<vmem>>, %arg8: memref<8x16xf32, #tpu.memory_space<vmem>>) attributes {dimension_semantics = [#tpu.dimension_semantics<parallel>, #tpu.dimension_semantics<arbitrary>], iteration_bounds = array<i64: 1, 1>, scalar_prefetch = 0 : i64, scratch_operands = 1 : i64, tpu.core_type = #tpu.core_type<tc>, window_params = [{transform_indices = @transform_0, window_bounds = array<i64: 8, 32>}, {transform_indices = @transform_1, window_bounds = array<i64: 8, 16>}, {transform_indices = @transform_2, window_bounds = array<i64: 8, 16>}, {pipeline_mode = #tpu.pipeline_mode<synchronous>, transform_indices = @transform_3, window_bounds = array<i64: 2, 32, 144>}, {pipeline_mode = #tpu.pipeline_mode<synchronous>, transform_indices = @transform_4, window_bounds = array<i64: 2, 1, 144>}, {transform_indices = @transform_5, window_bounds = array<i64: 1, 8, 128>}]} {
    %c0_i32 = arith.constant 0 : i32
    %0 = arith.cmpi eq, %arg1, %c0_i32 : i32
    %1 = arith.extui %0 : i1 to i32
    %c0_i32_0 = arith.constant 0 : i32
    %2 = arith.cmpi ne, %1, %c0_i32_0 : i32
    scf.if %2 {
      %cst_27 = arith.constant 0.000000e+00 : f32
      %44 = vector.broadcast %cst_27 : f32 to vector<8x16xf32>
      %c0_28 = arith.constant 0 : index
      %c0_29 = arith.constant 0 : index
      %45 = vector.load %arg8[%c0_28, %c0_29] : memref<8x16xf32, #tpu.memory_space<vmem>>, vector<8x16xf32>
      tpu.vector_store %arg8[%c0_28, %c0_29], %44 {strides = array<i32>} : memref<8x16xf32, #tpu.memory_space<vmem>>, vector<8x16xf32>,
    } else {
    }
    %c0 = arith.constant 0 : index
    %c0_1 = arith.constant 0 : index
    %3 = vector.load %arg2[%c0, %c0_1] : memref<8x32xbf16, #tpu.memory_space<vmem>>, vector<8x32xbf16>
    %4 = arith.extf %3 : vector<8x32xbf16> to vector<8x32xf32>
    %c0_2 = arith.constant 0 : index
    %c0_3 = arith.constant 0 : index
    %5 = vector.load %arg3[%c0_2, %c0_3] : memref<8x16xbf16, #tpu.memory_space<vmem>>, vector<8x16xbf16>
    %6 = arith.extf %5 : vector<8x16xbf16> to vector<8x16xf32>
    %c0_4 = arith.constant 0 : index
    %c0_5 = arith.constant 0 : index
    %7 = vector.load %arg4[%c0_4, %c0_5] : memref<8x16xbf16, #tpu.memory_space<vmem>>, vector<8x16xbf16>
    %8 = arith.extf %7 : vector<8x16xbf16> to vector<8x16xf32>
    %c0_6 = arith.constant 0 : index
    %c0_7 = arith.constant 0 : index
    %c0_8 = arith.constant 0 : index
    %9 = vector.load %arg5[%c0_6, %c0_7, %c0_8] : memref<2x32x144xf32, #tpu.memory_space<vmem>>, vector<1x32x32xf32>
    %10 = vector.shape_cast %9 : vector<1x32x32xf32> to vector<32x32xf32>
    %c0_9 = arith.constant 0 : index
    %c0_10 = arith.constant 0 : index
    %c0_11 = arith.constant 0 : index
    %11 = vector.load %arg6[%c0_9, %c0_10, %c0_11] : memref<2x1x144xf32, #tpu.memory_space<vmem>>, vector<1x1x32xf32>
    %12 = vector.shape_cast %11 : vector<1x1x32xf32> to vector<1x32xf32>
    %cst = arith.constant dense<0.000000e+00> : vector<8x32xf32>
    %13 = tpu.matmul %4, %10, %cst {dimension_numbers = #tpu.dot_dimension_numbers<[1], [0], [0], [1], [0, 0, 1, 1], [], []>} : vector<8x32xf32>, vector<32x32xf32>, vector<8x32xf32> -> vector<8x32xf32>
    %14 = vector.broadcast %12 : vector<1x32xf32> to vector<8x32xf32>
    %15 = arith.addf %13, %14 : vector<8x32xf32>
    %cst_12 = arith.constant 0.000000e+00 : f32
    %16 = vector.broadcast %cst_12 : f32 to vector<8x32xf32>
    %17 = arith.maximumf %15, %16 : vector<8x32xf32>
    %c1 = arith.constant 1 : index
    %c0_13 = arith.constant 0 : index
    %c0_14 = arith.constant 0 : index
    %18 = vector.load %arg5[%c1, %c0_13, %c0_14] : memref<2x32x144xf32, #tpu.memory_space<vmem>>, vector<1x32x144xf32>
    %19 = vector.shape_cast %18 : vector<1x32x144xf32> to vector<32x144xf32>
    %c1_15 = arith.constant 1 : index
    %c0_16 = arith.constant 0 : index
    %c0_17 = arith.constant 0 : index
    %20 = vector.load %arg6[%c1_15, %c0_16, %c0_17] : memref<2x1x144xf32, #tpu.memory_space<vmem>>, vector<1x1x144xf32>
    %21 = vector.shape_cast %20 : vector<1x1x144xf32> to vector<1x144xf32>
    %cst_18 = arith.constant dense<0.000000e+00> : vector<8x144xf32>
    %22 = tpu.matmul %17, %19, %cst_18 {dimension_numbers = #tpu.dot_dimension_numbers<[1], [0], [0], [1], [0, 0, 1, 1], [], []>} : vector<8x32xf32>, vector<32x144xf32>, vector<8x144xf32> -> vector<8x144xf32>
    %23 = vector.broadcast %21 : vector<1x144xf32> to vector<8x144xf32>
    %24 = arith.addf %22, %23 : vector<8x144xf32>
    %25 = vector.extract_strided_slice %24 {offsets = [0, 0], sizes = [8, 16], strides = [1, 1]} : vector<8x144xf32> to vector<8x16xf32>
    %26 = vector.extract_strided_slice %24 {offsets = [0, 128], sizes = [8, 16], strides = [1, 1]} : vector<8x144xf32> to vector<8x16xf32>
    %27 = math.tanh %26 : vector<8x16xf32>
    %cst_19 = arith.constant 0.000000e+00 : f32
    %28 = vector.broadcast %cst_19 : f32 to vector<8x16xf32>
    %29 = arith.subf %28, %27 : vector<8x16xf32>
    %30 = math.exp %29 : vector<8x16xf32>
    %31 = arith.subf %6, %8 : vector<8x16xf32>
    %cst_20 = arith.constant 2.000000e+00 : f32
    %32 = vector.broadcast %cst_20 : f32 to vector<8x16xf32>
    %33 = arith.mulf %32, %25 : vector<8x16xf32>
    %34 = arith.subf %33, %6 : vector<8x16xf32>
    %35 = arith.subf %34, %8 : vector<8x16xf32>
    %36 = arith.mulf %31, %35 : vector<8x16xf32>
    %37 = arith.mulf %36, %30 : vector<8x16xf32>
    %c0_21 = arith.constant 0 : index
    %c0_22 = arith.constant 0 : index
    %38 = vector.load %arg8[%c0_21, %c0_22] : memref<8x16xf32, #tpu.memory_space<vmem>>, vector<8x16xf32>
    %39 = arith.addf %38, %37 : vector<8x16xf32>
    %c0_23 = arith.constant 0 : index
    %c0_24 = arith.constant 0 : index
    %40 = vector.load %arg8[%c0_23, %c0_24] : memref<8x16xf32, #tpu.memory_space<vmem>>, vector<8x16xf32>
    tpu.vector_store %arg8[%c0_23, %c0_24], %39 {strides = array<i32>} : memref<8x16xf32, #tpu.memory_space<vmem>>, vector<8x16xf32>,
    %c0_i32_25 = arith.constant 0 : i32
    %41 = arith.cmpi eq, %arg1, %c0_i32_25 : i32
    %42 = arith.extui %41 : i1 to i32
    %c0_i32_26 = arith.constant 0 : i32
    %43 = arith.cmpi ne, %42, %c0_i32_26 : i32
    scf.if %43 {
      %c0_27 = arith.constant 0 : index
      %c0_28 = arith.constant 0 : index
      %44 = vector.load %arg8[%c0_27, %c0_28] : memref<8x16xf32, #tpu.memory_space<vmem>>, vector<8x16xf32>
      %45 = vector.shape_cast %44 : vector<8x16xf32> to vector<1x8x16xf32>
      %cst_29 = arith.constant dense<0.000000e+00> : vector<1xf32>
      %46 = vector.multi_reduction <add>, %45, %cst_29 [1, 2] : vector<1x8x16xf32> to vector<1xf32>
      %47 = vector.shape_cast %46 : vector<1xf32> to vector<1x1x1xf32>
      %48 = vector.extract %47[0, 0, 0] : f32 from vector<1x1x1xf32>
      %cst_30 = arith.constant 6.250000e-02 : f32
      %49 = arith.mulf %48, %cst_30 : f32
      %50 = vector.broadcast %49 : f32 to vector<1x8x128xf32>
      %c0_31 = arith.constant 0 : index
      %c0_32 = arith.constant 0 : index
      %c0_33 = arith.constant 0 : index
      %51 = vector.load %arg7[%c0_31, %c0_32, %c0_33] : memref<1x8x128xf32, #tpu.memory_space<vmem>>, vector<1x8x128xf32>
      tpu.vector_store %arg7[%c0_31, %c0_32, %c0_33], %50 {strides = array<i32>} : memref<1x8x128xf32, #tpu.memory_space<vmem>>, vector<1x8x128xf32>,
    } else {
    }
    return
  }
  func.func @transform_0(%arg0: i32, %arg1: i32) -> (i32, i32) {
    %c1_i32 = arith.constant 1 : i32
    %0 = arith.muli %arg0, %c1_i32 : i32
    %1 = arith.addi %0, %arg1 : i32
    %c0_i32 = arith.constant 0 : i32
    %c0_i32_0 = arith.constant 0 : i32
    return %1, %c0_i32 : i32, i32
  }
  func.func @transform_1(%arg0: i32, %arg1: i32) -> (i32, i32) {
    %c1_i32 = arith.constant 1 : i32
    %0 = arith.muli %arg0, %c1_i32 : i32
    %1 = arith.addi %0, %arg1 : i32
    %c0_i32 = arith.constant 0 : i32
    %c0_i32_0 = arith.constant 0 : i32
    return %1, %c0_i32 : i32, i32
  }
  func.func @transform_2(%arg0: i32, %arg1: i32) -> (i32, i32) {
    %c1_i32 = arith.constant 1 : i32
    %0 = arith.muli %arg0, %c1_i32 : i32
    %1 = arith.addi %0, %arg1 : i32
    %c0_i32 = arith.constant 0 : i32
    %c0_i32_0 = arith.constant 0 : i32
    return %1, %c0_i32 : i32, i32
  }
  func.func @transform_3(%arg0: i32, %arg1: i32) -> (i32, i32, i32) {
    %c0_i32 = arith.constant 0 : i32
    %c0_i32_0 = arith.constant 0 : i32
    %c0_i32_1 = arith.constant 0 : i32
    %c0_i32_2 = arith.constant 0 : i32
    return %c0_i32, %c0_i32_0, %c0_i32_1 : i32, i32, i32
  }
  func.func @transform_4(%arg0: i32, %arg1: i32) -> (i32, i32, i32) {
    %c0_i32 = arith.constant 0 : i32
    %c0_i32_0 = arith.constant 0 : i32
    %c0_i32_1 = arith.constant 0 : i32
    %c0_i32_2 = arith.constant 0 : i32
    return %c0_i32, %c0_i32_0, %c0_i32_1 : i32, i32, i32
  }
  func.func @transform_5(%arg0: i32, %arg1: i32) -> (i32, i32, i32) {
    %c0_i32 = arith.constant 0 : i32
    %c0_i32_0 = arith.constant 0 : i32
    %c0_i32_1 = arith.constant 0 : i32
    return %arg0, %c0_i32, %c0_i32_0 : i32, i32, i32
  }
}

</mosaic_0001>

<bundles_post_ra>
// kernel: tpu_custom_call.1
= control target key start
LH: loop header
LB: loop body
LE: loop exit
PB: predicated region body
PF: predicated region fallthrough
CT: control target
= control target key end

     0   :  { %10 = vsyncpa [#allocation4], 0  ;;  %s532_s0 = inlined_call_operand.hbm [shape: bf16[8,32], index: 0, kind: input, shape index: {}]   ;;  %s533_s1 = inlined_call_operand.hbm [shape: bf16[8,16], index: 1, kind: input, shape index: {}]   ;;  %s534_s2 = inlined_call_operand.hbm [shape: bf16[8,16], index: 2, kind: input, shape index: {}]   ;;  %s535_s3 = inlined_call_operand.hbm [shape: f32[2,32,144], index: 3, kind: input, shape index: {}]   ;;  %s536_s4 = inlined_call_operand.vmem [shape: f32[2,1,144], index: 4, kind: input, shape index: {}]   ;;  %s537_s5 = inlined_call_operand.hbm [shape: f32[1,8,128], index: 5, kind: output, shape index: {}]  }
   0x1   :  { %11 = vsyncpa [#allocation7], 0 }
   0x2   :  { %12 = vsyncpa [#allocation10], 0 }
   0x3   :  { %13 = vsyncpa [#allocation5], 0  ;;  %s467_s18 = smov [#allocation6]   ;;  %s468_s20 = smov [#allocation3]  }
   0x4   :  { %s36_s19 = sshll.u32 %s467_s18, 4  ;;  %s23_s21 = sshll.u32 %s468_s20, 4  ;;  %s37_s19 = int_to_ptr.vmem [resolvable:$true] %s36_s19  ;;  %s24_s21 = int_to_ptr.vmem [resolvable:$true] %s23_s21 }
   0x5   :  { %s367_s22 = scalar_lea.vmem %s37_s19, 64  ;;  %p372_p1 = scmp.lt.s32.totalorder %s37_s19, %s37_s19 }
   0x6   :  { %p368_p0 = scmp.ne.s32.totalorder %s37_s19, %s367_s22  ;;  %p373_p2 = scmp.lt.s32.totalorder %s367_s22, %s367_s22 }
   0x8   :  { %p374_p3 = por %p373_p2, %p372_p1 }
   0xa   :  { %p375_p4 = pnand %p374_p3, %p368_p0 }
   0xc   :  { %378 = shalt.err (!%p375_p4)
}
   0xd   :  { %39 = dma.hbm_to_vmem [thread:$0]  %s533_s1, 64, %s37_s19, [#allocation7]  }
   0xe   :  { %s387_s25 = scalar_lea.vmem %s24_s21, 64  ;;  %p392_p6 = scmp.lt.s32.totalorder %s24_s21, %s24_s21 }
   0xf   :  { %p388_p5 = scmp.ne.s32.totalorder %s24_s21, %s387_s25  ;;  %p393_p7 = scmp.lt.s32.totalorder %s387_s25, %s387_s25 }
  0x11   :  { %p394_p8 = por %p393_p7, %p392_p6 }
  0x13   :  { %p395_p9 = pnand %p394_p8, %p388_p5 }
  0x15   :  { %398 = shalt.err (!%p395_p9)
}
  0x16   :  { %26 = dma.hbm_to_vmem [thread:$0]  %s532_s0, 64, %s24_s21, [#allocation4]  }
  0x17   :  { %s469_s28 = smov [#allocation8]   ;;  %s470_s30 = smov [#allocation9]  }
  0x18   :  { %s49_s29 = sshll.u32 %s469_s28, 4  ;;  %s58_s6 = sshll.u32 %s470_s30, 4  ;;  %s50_s29 = int_to_ptr.vmem [resolvable:$true] %s49_s29  ;;  %s59_s6 = int_to_ptr.vmem [resolvable:$true] %s58_s6 }
  0x19   :  { %s407_s7 = scalar_lea.vmem %s50_s29, 64  ;;  %p412_p11 = scmp.lt.s32.totalorder %s50_s29, %s50_s29 }
  0x1a   :  { %p408_p10 = scmp.ne.s32.totalorder %s50_s29, %s407_s7  ;;  %p413_p12 = scmp.lt.s32.totalorder %s407_s7, %s407_s7 }
  0x1c   :  { %p414_p13 = por %p413_p12, %p412_p11 }
  0x1e   :  { %p415_p0 = pnand %p414_p13, %p408_p10 }
  0x20   :  { %418 = shalt.err (!%p415_p0)
}
  0x21   :  { %52 = dma.hbm_to_vmem [thread:$0]  %s534_s2, 64, %s50_s29, [#allocation7]  }
  0x22   :  { %s427_s9 = scalar_lea.vmem %s59_s6, 2048  ;;  %p432_p2 = scmp.lt.s32.totalorder %s59_s6, %s59_s6 }
  0x23   :  { %p428_p1 = scmp.ne.s32.totalorder %s59_s6, %s427_s9  ;;  %p433_p3 = scmp.lt.s32.totalorder %s427_s9, %s427_s9 }
  0x25   :  { %p434_p4 = por %p433_p3, %p432_p2 }
  0x27   :  { %p435_p5 = pnand %p434_p4, %p428_p1 }
  0x29   :  { %438 = shalt.err (!%p435_p5)
}
  0x2a   :  { %s471_s0 = smov 256   ;;  %s472_s10 = smov 16  }
  0x2b   :  { %64 = dma.hbm_to_vmem [thread:$0]  %s535_s3, 2048, %s59_s6, [#allocation10], %s471_s0, %s471_s0, %s472_s10  }
  0x2c   :  { %459 = dma.done.wait [#allocation4], 64  }
  0x2d   :  { %460 = vsyncadd [#allocation4], 4294967232 }
  0x2e   :  { %461 = dma.done.wait [#allocation7], 128  }
  0x2f   :  { %462 = vsyncadd [#allocation7], 4294967168 }
  0x30   :  { %463 = dma.done.wait [#allocation10], 2048  }
  0x31   :  { %464 = vsyncadd [#allocation10], 4294965248  ;;  %v473_v0 = vmov 0.0   ;;  %vm474_vm0 = vmmov 0   ;;  %v97_v1 = vld [vmem:[#allocation9 + $0x30] sm:$0xff]  ;;  %v96_v2 = vld [vmem:[#allocation9 + $0x20] sm:$0xff]  ;;  %v192_v20 = vlaneseq }
  0x32   :  { %333 = vmatprep.subr.mxu0 %v473_v0  ;;  %341 = vmatprep.mubr.msk.f32.mxu0 %vm474_vm0, %v473_v0  ;;  %v88_v3 = vld [vmem:[#allocation3] sm:$0xf]  ;;  %v188_v4 = vld [vmem:[#allocation9 + $0x78] sm:$0xff]  ;;  %v186_v7 = vld [vmem:[#allocation9 + $0x68] sm:$0xff]  ;;  %vm105_vm1 = vcmask 261120   ;;  %vm86_vm2 = vcmask 130048  }
  0x33   :  { %269 = vmatprep.mubr.f32.mxu1 %v473_v0  ;;  %334 = vmatpush3.msra.mxu0 %v97_v1  ;;  %v95_v5 = vld [vmem:[#allocation9 + $0x10] sm:$0xff]  ;;  %v94_v8 = vld [vmem:[#allocation9] sm:$0xff]  ;;  %v89_v9 = vunpack.c.l.bf16 %v88_v3  ;;  %v184_v11 = vld [vmem:[#allocation9 + $0x58] sm:$0xff]  ;;  %87 = vst.msk [vmem:[#allocation2] sm:$0xff] %vm86_vm2, %v473_v0  ;;  %v193_v21 = vshrl.u32 %v192_v20, 7 }
  0x34   :  { %335 = vmatprep.subr.mxu0 %v473_v0  ;;  %229 = vmatprep.subr.mxu1 %v188_v4  ;;  %v187_v6 = vld [vmem:[#allocation9 + $0x70] sm:$0xff]  ;;  %v185_v10 = vld [vmem:[#allocation9 + $0x60] sm:$0xff]  ;;  %v182_v13 = vld [vmem:[#allocation9 + $0x48] sm:$0xff] }
  0x35   :  { %336 = vmatpush3.msra.mxu0 %v96_v2  ;;  %230 = vmatpush1.msra.mxu1 %v187_v6  ;;  %v183_v12 = vld [vmem:[#allocation9 + $0x50] sm:$0xff]  ;;  %v181_v14 = vld [vmem:[#allocation9 + $0x40] sm:$0xff]  ;;  %v324_v15 = vld [vmem:[%s536_s4] ss:$0 sm:$0xff]  ;;  %v198_v22 = vsub.s32 1, %v193_v21  ;;  %v194_v28 = vsub.s32 0, %v193_v21 }
  0x36   :  { %337 = vmatprep.subr.mxu0 %v473_v0  ;;  %231 = vmatprep.subr.mxu1 %v186_v7  ;;  %v326_v23 = vld [vmem:[%s536_s4 + $0x2] sm:$0x3]  ;;  %v90_v33 = vld [vmem:[#allocation6] sm:$0xf]  ;;  %v92_v37 = vld [vmem:[#allocation8] sm:$0xf] }
  0x37   :  { %338 = vmatpush3.msra.mxu0 %v95_v5  ;;  %232 = vmatpush1.msra.mxu1 %v185_v10  ;;  %v199_v24 = vrot.slane %v326_v23, %v198_v22  ;;  %v195_v29 = vrot.slane %v326_v23, %v194_v28  ;;  %v91_v35 = vunpack.c.l.bf16 %v90_v33  ;;  %v93_v38 = vunpack.c.l.bf16 %v92_v37  ;;  %s475_s4 = smov [#allocation11]  }
  0x38   :  { %339 = vmatprep.subr.mxu0 %v473_v0  ;;  %233 = vmatprep.subr.mxu1 %v184_v11  ;;  %s313_s15 = sshll.u32 %s475_s4, 4  ;;  %s314_s15 = int_to_ptr.vmem [resolvable:$true] %s313_s15 }
  0x39   :  { %340 = vmatpush3.msra.mxu0 %v94_v8  ;;  %234 = vmatpush1.msra.mxu1 %v183_v12  ;;  %v280_v40 = vsub.f32 %v91_v35, %v93_v38  ;;  %s439_s18 = scalar_lea.vmem %s314_s15, 128  ;;  %p444_p7 = scmp.lt.s32.totalorder %s314_s15, %s314_s15 }
  0x3a   :  { %342 = vmatmul.mubr.msk.f32.vlgmr.msra.gmra.mxu0 %vm105_vm1, %v89_v9  ;;  %235 = vmatprep.subr.mxu1 %v182_v13  ;;  %v286_v44 = vld [vmem:[#allocation2] sm:$0xff]  ;;  %p440_p6 = scmp.ne.s32.totalorder %s314_s15, %s439_s18  ;;  %p445_p8 = scmp.lt.s32.totalorder %s439_s18, %s439_s18 }
  0x3b   :  { %236 = vmatpush1.msra.mxu1 %v181_v14 }
  0x3c   :  { %p446_p9 = por %p445_p8, %p444_p7 }
  0x3e   :  { %p447_p10 = pnand %p446_p9, %p440_p6 }
  0xfa   :  { %v175_v16 = vpop.f32.mrf.mxu0 }
  0xfb   :  { %v176_v17 = vadd.f32 %v324_v15, %v175_v16 }
  0xfc   :  { %v343_v18 = vpop.f32.mrf.mxu0 }
  0xfd   :  { %v179_v19 = vmax.f32 %v176_v17, 0.0 }
  0xff   :  { %327 = vmatmul.mubr.msk.f32.vlgmr.msra.gmra.mxu1 %vm105_vm1, %v179_v19 }
 0x1bf   :  { %v271_v25 = vpop.f32.mrf.mxu1 }
 0x1c0   :  { %v272_v31 = vadd.f32 %v271_v25, %v195_v29 }
 0x1c1   :  { %v273_v26 = vpop.f32.mrf.mxu1 }
 0x1c2   :  { %v274_v27 = vadd.f32 %v273_v26, %v199_v24  ;;  %v281_v36 = vmul.f32 2.0, %v272_v31 }
 0x1c4   :  { %355 = vtanh.f32 %v274_v27  ;;  %v282_v39 = vsub.f32 %v281_v36, %v91_v35 }
 0x1c6   :  { %v283_v41 = vsub.f32 %v282_v39, %v93_v38 }
 0x1c8   :  { %v284_v42 = vmul.f32 %v283_v41, %v280_v40 }
 0x1d1   :  { %v356_v30 = vpop.eup %355 }
 0x1d2   :  { %v277_v32 = vsub.f32 0.0, %v356_v30 }
 0x1d4   :  { %v278_v34 = vmul.f32 1.442695, %v277_v32 }
 0x1d6   :  { %357 = vpow2.f32 %v278_v34 }
 0x1e3   :  { %v358_v43 = vpop.eup %357 }
 0x1e4   :  { %v285_v45 = vmul.f32 %v358_v43, %v284_v42 }
 0x1e6   :  { %v287_v46 = vadd.f32 %v286_v44, %v285_v45 }
 0x1e8   :  { %289 = vst.msk [vmem:[#allocation2] sm:$0xff] %vm86_vm2, %v287_v46 }
 0x1ef   :  { %v293_v47 = vld [vmem:[#allocation2] sm:$0xff] }
 0x1f0   :  { %v294_v48 = vsel %vm86_vm2, %v293_v47, 0.0 }
 0x1f1   :  { %295 = vadd.xlane.f32.xlu0 %v294_v48 }
 0x27a   :  { %v296_v49 = vpop.xlane.xlu0 %295 }
 0x27b   :  { %v297_v50 = vrot.slane %v296_v49, 4 }
 0x27d   :  { %v298_v51 = vadd.f32 %v297_v50, %v296_v49 }
 0x27f   :  { %v299_v52 = vrot.slane %v298_v51, 2 }
 0x281   :  { %v300_v53 = vadd.f32 %v299_v52, %v298_v51 }
 0x283   :  { %v301_v54 = vrot.slane %v300_v53, 1 }
 0x285   :  { %v302_v55 = vadd.f32 %v301_v54, %v300_v53 }
 0x287   :  { %344 = vpush %v302_v55 }
 0x2b8   :  { %s345_s16 = spop %344 }
 0x2b9   :  { %s304_s17 = smul.f32 0.0625, %s345_s16 }
 0x2bb   :  { %v305_v56 = vstv %s304_s17 }
 0x2bc   :  { %306 = vst [vmem:[#allocation11] sm:$0xff] %v305_v56 }
 0x2bd   :  { %450 = shalt.err (!%p447_p10)
}
 0x2be   :  { %316 = dma.vmem_to_hbm [thread:$0]  %s314_s15, 128, %s537_s5, [#allocation5]  }
 0x2bf   :  { %465 = dma.done.wait [#allocation5], 128  }
 0x2c0   :  { %466 = vsyncadd [#allocation5], 4294967168 }
 0x2c1   :  { %320 = vsyncpa [#allocation4], 1 }
 0x2c2   :  { %321 = vsyncpa [#allocation7], 1 }
 0x2c3   :  { %322 = vsyncpa [#allocation10], 1 }
 0x2c4   :  { %323 = vsyncpa [#allocation5], 1 }

</bundles_post_ra>
